<compile_context>
chip_gen: v7x
topology: tpu7x:2x2x1
jax: 0.10.0
libtpu: 0.0.40
codegen_flags: <defaults>
</compile_context>

<pallas_src>
import jax
import jax.numpy as jnp
from jax.experimental import pallas as pl
from jax.experimental.pallas import tpu as pltpu


EMBED_DIM = 512      # resnet18.fc.in_features
NUM_CLASSES = 10


# ----------------------------------------------------------------------------
# Pallas kernel: (TM, K) @ (K, NP) on the MXU, bf16 operands / f32 accumulate,
# fused bias-add epilogue.  x arrives f32 and is cast on the VPU in-kernel.
# ----------------------------------------------------------------------------
def _linear_kernel(x_ref, w_ref, b_ref, o_ref):
    acc = jnp.dot(x_ref[...].astype(jnp.bfloat16), w_ref[...],
                  preferred_element_type=jnp.float32)
    o_ref[...] = (acc + b_ref[...]).astype(o_ref.dtype)


def _round_up(x, m):
    return ((x + m - 1) // m) * m


def linear_classifier(x, w_oi, b_o):
    """y = x @ w_oi.T + b_o via one Pallas GEMM.

    x: (N, K) f32; w_oi: (num_classes, K) f32 (PyTorch nn.Linear layout);
    b_o: (num_classes,) f32.  Returns (N, num_classes) f32.
    """
    n, k = x.shape
    nc = w_oi.shape[0]

    # Lane-dense output: pad class dim up to a multiple of 128 lanes.
    np_ = _round_up(max(nc, 128), 128)

    # One-time weight/bias prep (tiny: 512 x 128).
    wb = jnp.pad(jnp.transpose(w_oi, (1, 0)).astype(jnp.bfloat16),
                 ((0, 0), (0, np_ - nc)))
    bb = jnp.pad(b_o.astype(jnp.float32), (0, np_ - nc)).reshape(1, np_)

    # Row tiling: 128-row tiles for large batches, sublane-rounded otherwise.
    tm = 128 if n >= 128 else _round_up(n, 8)
    mp = _round_up(n, tm)
    xp = x if mp == n else jnp.pad(x, ((0, mp - n), (0, 0)))

    out = pl.pallas_call(
        _linear_kernel,
        out_shape=jax.ShapeDtypeStruct((mp, np_), jnp.float32),
        grid=(mp // tm,),
        in_specs=[
            pl.BlockSpec((tm, k), lambda i: (i, 0)),     # activations: row-tiled
            pl.BlockSpec((k, np_), lambda i: (0, 0)),    # weights: resident
            pl.BlockSpec((1, np_), lambda i: (0, 0)),    # bias: resident
        ],
        out_specs=pl.BlockSpec((tm, np_), lambda i: (i, 0)),
        compiler_params=pltpu.CompilerParams(
            dimension_semantics=("parallel",),
        ),
    )(xp, wb, bb)
    return out[:n, :nc]


# ----------------------------------------------------------------------------
# Deterministic parameters (nn.Linear(512, num_classes)-style init)
# ----------------------------------------------------------------------------
def make_params(key, dim=EMBED_DIM, num_classes=NUM_CLASSES):
    kw, kb = jax.random.split(key)
    bound = 1.0 / float(jnp.sqrt(dim))
    w = jax.random.uniform(kw, (num_classes, dim), jnp.float32, -bound, bound)
    b = jax.random.uniform(kb, (num_classes,), jnp.float32, -bound, bound)
    return {"clf_w": w, "clf_b": b}


# ----------------------------------------------------------------------------
# Forward pass == CLF_WAAL.forward
# ----------------------------------------------------------------------------
def clf_waal_forward(params, x):
    """output = classifier(x); return (output, x)."""
    output = linear_classifier(x, params["clf_w"], params["clf_b"])
    return output, x
    # TODO(synk): self.features (ResNet-18 trunk) is built in __init__ but is
    # never invoked in forward(), so it is intentionally not implemented.


if __name__ == "__main__":
    key = jax.random.PRNGKey(0)
    kp, kx = jax.random.split(key)
    params = make_params(kp)
    x = jax.random.normal(kx, (2, EMBED_DIM), jnp.float32)  # (batch=2, 512) embedding

    fwd = jax.jit(clf_waal_forward)
    out, feat = jax.block_until_ready(fwd(params, x))

    assert out.shape == (2, NUM_CLASSES), out.shape
    assert out.dtype == jnp.float32
    assert feat.shape == (2, EMBED_DIM)
    assert bool(jnp.all(jnp.isfinite(out)))

    # Reference check (loose tolerance: bf16 MXU operands, f32 accumulation).
    ref = x @ params["clf_w"].T + params["clf_b"]
    assert bool(jnp.allclose(out, ref, atol=5e-2, rtol=5e-2)), \
        float(jnp.max(jnp.abs(out - ref)))

    print("KERNEL_OK")
</pallas_src>

<mosaic_0001>
module attributes {stable_mosaic.version = 11 : i64} {
  func.func @_linear_kernel(%arg0: i32, %arg1: memref<8x512xf32, #tpu.memory_space<vmem>>, %arg2: memref<512x128xbf16, #tpu.memory_space<vmem>>, %arg3: memref<1x128xf32, #tpu.memory_space<vmem>>, %arg4: memref<8x128xf32, #tpu.memory_space<vmem>>) attributes {dimension_semantics = [#tpu.dimension_semantics<parallel>], iteration_bounds = array<i64: 1>, scalar_prefetch = 0 : i64, scratch_operands = 0 : i64, tpu.core_type = #tpu.core_type<tc>, window_params = [{transform_indices = @transform_0, window_bounds = array<i64: 8, 512>}, {pipeline_mode = #tpu.pipeline_mode<synchronous>, transform_indices = @transform_1, window_bounds = array<i64: 512, 128>}, {pipeline_mode = #tpu.pipeline_mode<synchronous>, transform_indices = @transform_2, window_bounds = array<i64: 1, 128>}, {transform_indices = @transform_3, window_bounds = array<i64: 8, 128>}]} {
    %c0 = arith.constant 0 : index
    %c0_0 = arith.constant 0 : index
    %0 = vector.load %arg1[%c0, %c0_0] : memref<8x512xf32, #tpu.memory_space<vmem>>, vector<8x512xf32>
    %1 = arith.truncf %0 : vector<8x512xf32> to vector<8x512xbf16>
    %c0_1 = arith.constant 0 : index
    %c0_2 = arith.constant 0 : index
    %2 = vector.load %arg2[%c0_1, %c0_2] : memref<512x128xbf16, #tpu.memory_space<vmem>>, vector<512x128xbf16>
    %cst = arith.constant dense<0.000000e+00> : vector<8x128xf32>
    %3 = tpu.matmul %1, %2, %cst {dimension_numbers = #tpu.dot_dimension_numbers<[1], [0], [0], [1], [0, 0, 1, 1], [], []>} : vector<8x512xbf16>, vector<512x128xbf16>, vector<8x128xf32> -> vector<8x128xf32>
    %c0_3 = arith.constant 0 : index
    %c0_4 = arith.constant 0 : index
    %4 = vector.load %arg3[%c0_3, %c0_4] : memref<1x128xf32, #tpu.memory_space<vmem>>, vector<1x128xf32>
    %5 = vector.broadcast %4 : vector<1x128xf32> to vector<8x128xf32>
    %6 = arith.addf %3, %5 : vector<8x128xf32>
    %c0_5 = arith.constant 0 : index
    %c0_6 = arith.constant 0 : index
    %7 = vector.load %arg4[%c0_5, %c0_6] : memref<8x128xf32, #tpu.memory_space<vmem>>, vector<8x128xf32>
    tpu.vector_store %arg4[%c0_5, %c0_6], %6 {strides = array<i32>} : memref<8x128xf32, #tpu.memory_space<vmem>>, vector<8x128xf32>,
    return
  }
  func.func @transform_0(%arg0: i32) -> (i32, i32) {
    %c0_i32 = arith.constant 0 : i32
    %c0_i32_0 = arith.constant 0 : i32
    return %arg0, %c0_i32 : i32, i32
  }
  func.func @transform_1(%arg0: i32) -> (i32, i32) {
    %c0_i32 = arith.constant 0 : i32
    %c0_i32_0 = arith.constant 0 : i32
    %c0_i32_1 = arith.constant 0 : i32
    return %c0_i32, %c0_i32_0 : i32, i32
  }
  func.func @transform_2(%arg0: i32) -> (i32, i32) {
    %c0_i32 = arith.constant 0 : i32
    %c0_i32_0 = arith.constant 0 : i32
    %c0_i32_1 = arith.constant 0 : i32
    return %c0_i32, %c0_i32_0 : i32, i32
  }
  func.func @transform_3(%arg0: i32) -> (i32, i32) {
    %c0_i32 = arith.constant 0 : i32
    %c0_i32_0 = arith.constant 0 : i32
    return %arg0, %c0_i32 : i32, i32
  }
}

</mosaic_0001>

<bundles_post_ra>
// kernel: clf_waal_forward.1
= control target key start
LH: loop header
LB: loop body
LE: loop exit
PB: predicated region body
PF: predicated region fallthrough
CT: control target
= control target key end

     0   :  { %s614_s1 = inlined_call_operand.vmem [shape: bf16[512,128], index: 1, kind: input, shape index: {}]   ;;  %s615_s0 = inlined_call_operand.vmem [shape: f32[8,512], index: 0, kind: input, shape index: {}]   ;;  %s616_s2 = inlined_call_operand.vmem [shape: f32[1,128], index: 2, kind: input, shape index: {}]   ;;  %s617_s3 = inlined_call_operand.vmem [shape: f32[8,128], index: 3, kind: output, shape index: {}]  }
   0x1   :  { %v448_v0 = vld [vmem:[%s614_s1 + $0x40] sm:$0xff]   ;;  %v452_v4 = vld [vmem:[%s614_s1 + $0x48] sm:$0xff]   ;;  %v456_v8 = vld [vmem:[%s614_s1 + $0x50] sm:$0xff]  }
   0x2   :  { %v449_v1 = vld [vmem:[%s614_s1 + $0xc0] sm:$0xff]   ;;  %404 = vmatprep.subr.bf16.mxu0 %v448_v0  ;;  %v453_v5 = vld [vmem:[%s614_s1 + $0xc8] sm:$0xff]   ;;  %v457_v9 = vld [vmem:[%s614_s1 + $0xd0] sm:$0xff]  }
   0x3   :  { %v450_v2 = vld [vmem:[%s614_s1] sm:$0xff]   ;;  %426 = vmatprep.subr.bf16.mxu1 %v449_v1  ;;  %v454_v6 = vld [vmem:[%s614_s1 + $0x8] sm:$0xff]   ;;  %v458_v10 = vld [vmem:[%s614_s1 + $0x10] sm:$0xff]  }
   0x4   :  { %v451_v3 = vld [vmem:[%s614_s1 + $0x80] sm:$0xff]   ;;  %405 = vmatpush3.bf16.msra.mxu0 %v450_v2  ;;  %v455_v7 = vld [vmem:[%s614_s1 + $0x88] sm:$0xff]   ;;  %v459_v11 = vld [vmem:[%s614_s1 + $0x90] sm:$0xff]  }
   0x5   :  { %427 = vmatpush3.bf16.msra.mxu1 %v451_v3  ;;  %406 = vmatprep.subr.bf16.mxu0 %v452_v4  ;;  %v460_v12 = vld [vmem:[%s614_s1 + $0x58] sm:$0xff]   ;;  %v464_v16 = vld [vmem:[%s614_s1 + $0x60] sm:$0xff]   ;;  %v468_v20 = vld [vmem:[%s614_s1 + $0x68] sm:$0xff]  }
   0x6   :  { %428 = vmatprep.subr.bf16.mxu1 %v453_v5  ;;  %v461_v13 = vld [vmem:[%s614_s1 + $0xd8] sm:$0xff]   ;;  %v465_v17 = vld [vmem:[%s614_s1 + $0xe0] sm:$0xff]   ;;  %v469_v21 = vld [vmem:[%s614_s1 + $0xe8] sm:$0xff]  }
   0x7   :  { %v462_v14 = vld [vmem:[%s614_s1 + $0x18] sm:$0xff]   ;;  %v466_v18 = vld [vmem:[%s614_s1 + $0x20] sm:$0xff]   ;;  %v470_v22 = vld [vmem:[%s614_s1 + $0x28] sm:$0xff]  }
   0x8   :  { %407 = vmatpush3.bf16.msra.mxu0 %v454_v6  ;;  %v463_v15 = vld [vmem:[%s614_s1 + $0x98] sm:$0xff]   ;;  %v467_v19 = vld [vmem:[%s614_s1 + $0xa0] sm:$0xff]   ;;  %v471_v23 = vld [vmem:[%s614_s1 + $0xa8] sm:$0xff]  }
   0x9   :  { %429 = vmatpush3.bf16.msra.mxu1 %v455_v7  ;;  %408 = vmatprep.subr.bf16.mxu0 %v456_v8  ;;  %v472_v24 = vld [vmem:[%s614_s1 + $0x70] sm:$0xff]   ;;  %v476_v28 = vld [vmem:[%s614_s1 + $0x78] sm:$0xff]   ;;  %v16_v32 = vld [vmem:[%s615_s0 + $0x8] sm:$0xff] }
   0xa   :  { %430 = vmatprep.subr.bf16.mxu1 %v457_v9  ;;  %v473_v25 = vld [vmem:[%s614_s1 + $0xf0] sm:$0xff]   ;;  %v477_v29 = vld [vmem:[%s614_s1 + $0xf8] sm:$0xff]   ;;  %v15_v34 = vld [vmem:[%s615_s0] sm:$0xff]  ;;  %v20_v35 = vpack.c.bf16 %v16_v32, %v16_v32 }
   0xb   :  { %v474_v26 = vld [vmem:[%s614_s1 + $0x30] sm:$0xff]   ;;  %v478_v30 = vld [vmem:[%s614_s1 + $0x38] sm:$0xff]   ;;  %v19_v37 = vpack.c.bf16 %v15_v34, %v15_v34  ;;  %v371_v42 = vld [vmem:[%s616_s2] ss:$0 sm:$0xff] }
   0xc   :  { %409 = vmatpush3.bf16.msra.mxu0 %v458_v10  ;;  %v475_v27 = vld [vmem:[%s614_s1 + $0xb0] sm:$0xff]   ;;  %v479_v31 = vld [vmem:[%s614_s1 + $0xb8] sm:$0xff]   ;;  %318 = vmatprep.mubr.bf16.mxu0 %v20_v35 }
   0xd   :  { %431 = vmatpush3.bf16.msra.mxu1 %v459_v11  ;;  %410 = vmatprep.subr.bf16.mxu0 %v460_v12  ;;  %v18_v33 = vld [vmem:[%s615_s0 + $0x18] sm:$0xff]  ;;  %v17_v38 = vld [vmem:[%s615_s0 + $0x10] sm:$0xff] }
   0xe   :  { %432 = vmatprep.subr.bf16.mxu1 %v461_v13  ;;  %v22_v36 = vpack.c.bf16 %v18_v33, %v18_v33  ;;  %v21_v39 = vpack.c.bf16 %v17_v38, %v17_v38 }
  0x10   :  { %411 = vmatpush3.bf16.msra.mxu0 %v462_v14  ;;  %358 = vmatprep.mubr.bf16.mxu1 %v22_v36 }
  0x11   :  { %433 = vmatpush3.bf16.msra.mxu1 %v463_v15  ;;  %412 = vmatprep.subr.bf16.mxu0 %v464_v16 }
  0x12   :  { %434 = vmatprep.subr.bf16.mxu1 %v465_v17 }
  0x14   :  { %413 = vmatpush3.bf16.msra.mxu0 %v466_v18 }
  0x15   :  { %435 = vmatpush3.bf16.msra.mxu1 %v467_v19  ;;  %414 = vmatprep.subr.bf16.mxu0 %v468_v20 }
  0x16   :  { %436 = vmatprep.subr.bf16.mxu1 %v469_v21 }
  0x18   :  { %415 = vmatpush3.bf16.msra.mxu0 %v470_v22 }
  0x19   :  { %437 = vmatpush3.bf16.msra.mxu1 %v471_v23  ;;  %416 = vmatprep.subr.bf16.mxu0 %v472_v24 }
  0x1a   :  { %438 = vmatprep.subr.bf16.mxu1 %v473_v25 }
  0x1c   :  { %417 = vmatpush3.bf16.msra.mxu0 %v474_v26 }
  0x1d   :  { %439 = vmatpush3.bf16.msra.mxu1 %v475_v27  ;;  %418 = vmatprep.subr.bf16.mxu0 %v476_v28 }
  0x1e   :  { %440 = vmatprep.subr.bf16.mxu1 %v477_v29 }
  0x20   :  { %419 = vmatpush3.bf16.msra.mxu0 %v478_v30 }
  0x21   :  { %441 = vmatpush3.bf16.msra.mxu1 %v479_v31 }
  0x23   :  { %319 = vmatmul.mubr.bf16.vlgmr.msra.gmra.mrb[0].mxu0 %v19_v37 }
  0x24   :  { %359 = vmatmul.mubr.bf16.vlgmr.msra.gmra.mrb[0].mxu1 %v21_v39 }
  0xf6   :  { %v420_v40 = vpop.f32.mrb[0].mxu0 }
  0xf7   :  { %v442_v41 = vpop.f32.mrb[0].mxu1  ;;  %v421_v43 = vpop.f32.mrb[1].mxu0 }
  0xf8   :  { %v443_v44 = vpop.f32.mrb[1].mxu1  ;;  %v422_v45 = vadd.f32 %v421_v43, %v420_v40  ;;  %v423_v47 = vpop.f32.mrb[2].mxu0 }
  0xf9   :  { %v444_v46 = vadd.f32 %v443_v44, %v442_v41  ;;  %v445_v48 = vpop.f32.mrb[2].mxu1  ;;  %v424_v49 = vpop.f32.mrb[3].mxu0 }
  0xfa   :  { %v446_v50 = vpop.f32.mrb[3].mxu1  ;;  %v321_v51 = vadd.f32 %v422_v45, %v371_v42 }
  0xfc   :  { %v361_v52 = vadd.f32 %v444_v46, %v321_v51 }
  0xfe   :  { %366 = vst [vmem:[%s617_s3] sm:$0xff] %v361_v52 }

</bundles_post_ra>
